<compile_context>
chip_gen: v6e
topology: v6e:2x2x1
jax: 0.10.0
libtpu: 0.0.40
codegen_flags: <defaults>
</compile_context>

<pallas_src>
import functools
import numpy as np
import jax
import jax.numpy as jnp
from jax.experimental import pallas as pl
from jax.experimental.pallas import tpu as pltpu


# Route problems smaller than this through a plain XLA matmul instead of a
# pallas_call (custom-call dispatch dwarfs ~160K MACs).  Kept at 0 so the
# Pallas kernel is exercised by this script.
_PALLAS_MIN_OUT_ELEMS = 0


# ---------------------------------------------------------------------------
# Host-side: 1-D linear interpolation matrix matching
# torch.nn.functional.interpolate(..., align_corners=False) along one axis.
# (Downsampling matches F.interpolate only for antialias=False, the default.)
# ---------------------------------------------------------------------------
def _linear_interp_matrix(n_out: int, n_in: int) -> np.ndarray:
    w = np.zeros((n_out, n_in), dtype=np.float32)
    if n_out == n_in:
        np.fill_diagonal(w, 1.0)
        return w
    scale = n_in / n_out
    for i in range(n_out):
        src = (i + 0.5) * scale - 0.5
        if src < 0.0:
            src = 0.0
        i0 = min(int(np.floor(src)), n_in - 1)
        i1 = i0 + 1 if i0 < n_in - 1 else i0
        l1 = src - i0
        w[i, i0] += 1.0 - l1
        w[i, i1] += l1
    return w


# ---------------------------------------------------------------------------
# Pallas kernel: fused  out = wrow @ (lat @ wcolt)
# Reassociated so the big contraction runs with the small hidden row count and
# the VMEM-resident intermediate is lane-dense (r_in, c_out).
# ---------------------------------------------------------------------------
def _sep_interp_kernel(lat_ref, wrow_ref, wcolt_ref, o_ref):
    t = jnp.dot(lat_ref[...], wcolt_ref[...],
                preferred_element_type=jnp.float32)          # (r_in, c_out)
    o_ref[...] = jnp.dot(wrow_ref[...], t,
                         preferred_element_type=jnp.float32)  # (r_out, c_out)


def separable_interp(lat2, wrow, wcolt):
    """lat2: (r_in, c_in), wrow: (r_out, r_in), wcolt: (c_in, c_out)."""
    r_out = wrow.shape[0]
    c_out = wcolt.shape[1]
    # No grid, whole-array VMEM blocks: operands are a few KiB, so skip the
    # software pipeline entirely.
    return pl.pallas_call(
        _sep_interp_kernel,
        out_shape=jax.ShapeDtypeStruct((r_out, c_out), jnp.float32),
        in_specs=[
            pl.BlockSpec(memory_space=pltpu.MemorySpace.VMEM),
            pl.BlockSpec(memory_space=pltpu.MemorySpace.VMEM),
            pl.BlockSpec(memory_space=pltpu.MemorySpace.VMEM),
        ],
        out_specs=pl.BlockSpec(memory_space=pltpu.MemorySpace.VMEM),
    )(lat2, wrow, wcolt)


# ---------------------------------------------------------------------------
# InitialConditionInterp forward
# ---------------------------------------------------------------------------
def latent2source(latent, wrow, wcolt, dims):
    """latent: (1, 1, *hidden_dim) -> interpolated tensor reshaped to `dims`."""
    hidden = tuple(int(s) for s in latent.shape[2:])
    dims = tuple(int(d) for d in dims)
    if hidden == dims:                      # same shortcut as the PyTorch module
        return latent.reshape(dims)

    lat2 = latent.reshape(hidden[0], -1).astype(jnp.float32)
    if int(np.prod(dims)) < _PALLAS_MIN_OUT_ELEMS:
        out2 = jnp.dot(wrow, jnp.dot(lat2, wcolt))     # tiny-problem XLA path
    else:
        out2 = separable_interp(lat2, wrow, wcolt)
    return out2.reshape(dims)


def initial_condition_interp_forward(latent, wrow, wcolt, dims, spatial_dim):
    x = latent2source(latent, wrow, wcolt, dims)
    if spatial_dim == 1:
        x = x[0]                            # .squeeze(0)
    return x


def make_initial_condition_interp(dims, hidden_dim, key):
    """Mirrors InitialConditionInterp.__init__ (deterministic latent init).

    Also builds the per-axis interpolation weights ONCE here (hoisted out of
    the traced forward) and returns them as device arrays.
    """
    spatial_dim = len(hidden_dim)
    dims_full = [1] + list(dims) if len(dims) == 1 else list(dims)
    hidden_full = [1] + list(hidden_dim) if len(hidden_dim) == 1 else list(hidden_dim)
    scale = 1.0 / float(np.prod(hidden_dim))
    latent = scale * jax.random.uniform(key, (1, 1, *hidden_full), dtype=jnp.float32)

    if tuple(hidden_full) == tuple(dims_full):
        wrow = wcolt = None
    else:
        wrow = _linear_interp_matrix(dims_full[0], hidden_full[0])
        wcol = np.ones((1, 1), dtype=np.float32)
        for d_out, d_in in zip(dims_full[1:], hidden_full[1:]):
            wcol = np.kron(wcol, _linear_interp_matrix(d_out, d_in))
        wrow = jnp.asarray(wrow)
        wcolt = jnp.asarray(np.ascontiguousarray(wcol.T))   # (prod(hidden[1:]), prod(dims[1:]))

    return latent, wrow, wcolt, dims_full, spatial_dim


if __name__ == "__main__":
    key = jax.random.PRNGKey(0)
    k3, k2 = jax.random.split(key)

    # 3-D case: InitialConditionInterp([16, 16, 16], [8, 8, 8]) -> trilinear
    dims3, hidden3 = [16, 16, 16], [8, 8, 8]
    latent3, wrow3, wcolt3, dims3_full, sd3 = make_initial_condition_interp(dims3, hidden3, k3)
    fwd3 = jax.jit(functools.partial(
        initial_condition_interp_forward, dims=tuple(dims3_full), spatial_dim=sd3))
    out3 = jax.block_until_ready(fwd3(latent3, wrow3, wcolt3))
    assert out3.shape == (16, 16, 16), out3.shape
    assert bool(jnp.all(jnp.isfinite(out3)))

    # independent pure-JAX reference (separable einsum with the same 1-D weights)
    w0 = jnp.asarray(_linear_interp_matrix(16, 8))
    ref3 = jnp.einsum("ai,bj,ck,ijk->abc", w0, w0, w0, latent3.reshape(8, 8, 8))
    assert float(jnp.max(jnp.abs(out3 - ref3))) < 1e-5

    # 2-D case: InitialConditionInterp([16, 16], [8, 8]) -> bilinear
    dims2, hidden2 = [16, 16], [8, 8]
    latent2, wrow2, wcolt2, dims2_full, sd2 = make_initial_condition_interp(dims2, hidden2, k2)
    fwd2 = jax.jit(functools.partial(
        initial_condition_interp_forward, dims=tuple(dims2_full), spatial_dim=sd2))
    out2 = jax.block_until_ready(fwd2(latent2, wrow2, wcolt2))
    assert out2.shape == (16, 16), out2.shape
    ref2 = jnp.einsum("ai,bj,ij->ab", w0, w0, latent2.reshape(8, 8))
    assert float(jnp.max(jnp.abs(out2 - ref2))) < 1e-5

    print("KERNEL_OK")
</pallas_src>

<mosaic_0001>
module attributes {stable_mosaic.version = 11 : i64} {
  func.func @_sep_interp_kernel(%arg0: memref<8x64xf32, #tpu.memory_space<vmem>>, %arg1: memref<16x8xf32, #tpu.memory_space<vmem>>, %arg2: memref<64x256xf32, #tpu.memory_space<vmem>>, %arg3: memref<16x256xf32, #tpu.memory_space<vmem>>) attributes {dimension_semantics = [], scalar_prefetch = 0 : i64, scratch_operands = 0 : i64, tpu.core_type = #tpu.core_type<tc>} {
    %c0 = arith.constant 0 : index
    %c0_0 = arith.constant 0 : index
    %0 = vector.load %arg0[%c0, %c0_0] : memref<8x64xf32, #tpu.memory_space<vmem>>, vector<8x64xf32>
    %c0_1 = arith.constant 0 : index
    %c0_2 = arith.constant 0 : index
    %1 = vector.load %arg2[%c0_1, %c0_2] : memref<64x256xf32, #tpu.memory_space<vmem>>, vector<64x256xf32>
    %cst = arith.constant dense<0.000000e+00> : vector<8x256xf32>
    %2 = tpu.matmul %0, %1, %cst {dimension_numbers = #tpu.dot_dimension_numbers<[1], [0], [0], [1], [0, 0, 1, 1], [], []>} : vector<8x64xf32>, vector<64x256xf32>, vector<8x256xf32> -> vector<8x256xf32>
    %c0_3 = arith.constant 0 : index
    %c0_4 = arith.constant 0 : index
    %3 = vector.load %arg1[%c0_3, %c0_4] : memref<16x8xf32, #tpu.memory_space<vmem>>, vector<16x8xf32>
    %cst_5 = arith.constant dense<0.000000e+00> : vector<16x256xf32>
    %4 = tpu.matmul %3, %2, %cst_5 {dimension_numbers = #tpu.dot_dimension_numbers<[1], [0], [0], [1], [0, 0, 1, 1], [], []>} : vector<16x8xf32>, vector<8x256xf32>, vector<16x256xf32> -> vector<16x256xf32>
    %c0_6 = arith.constant 0 : index
    %c0_7 = arith.constant 0 : index
    %5 = vector.load %arg3[%c0_6, %c0_7] : memref<16x256xf32, #tpu.memory_space<vmem>>, vector<16x256xf32>
    tpu.vector_store %arg3[%c0_6, %c0_7], %4 {strides = array<i32>} : memref<16x256xf32, #tpu.memory_space<vmem>>, vector<16x256xf32>,
    return
  }
}

</mosaic_0001>

<bundles_post_ra>
// kernel: initial_condition_interp_forward.1
= control target key start
LH: loop header
LB: loop body
LE: loop exit
PB: predicated region body
PF: predicated region fallthrough
CT: control target
= control target key end

     0   :  { %8 = vsyncpa [#allocation3], 0  ;;  %s244_s12 = smov [#allocation2]   ;;  %s292_s0 = inlined_call_operand.vmem [shape: f32[8,64], index: 0, kind: input, shape index: {}]   ;;  %s293_s1 = inlined_call_operand.vmem [shape: f32[16,8], index: 1, kind: input, shape index: {}]   ;;  %s294_s2 = inlined_call_operand.hbm [shape: f32[64,256], index: 2, kind: input, shape index: {}]   ;;  %s295_s3 = inlined_call_operand.vmem [shape: f32[16,256], index: 3, kind: output, shape index: {}]  }
   0x1   :  { %s18_s13 = sshll.u32 %s244_s12, 4  ;;  %s19_s13 = int_to_ptr.vmem [resolvable:$true] %s18_s13 }
   0x2   :  { %s230_s14 = scalar_lea.vmem %s19_s13, 2048  ;;  %p235_p1 = scmp.lt.s32.totalorder %s19_s13, %s19_s13 }
   0x3   :  { %p231_p0 = scmp.ne.s32.totalorder %s19_s13, %s230_s14  ;;  %p236_p2 = scmp.lt.s32.totalorder %s230_s14, %s230_s14 }
   0x5   :  { %p237_p3 = por %p236_p2, %p235_p1 }
   0x7   :  { %p238_p4 = pnand %p237_p3, %p231_p0 }
   0x9   :  { %241 = shalt.err (!%p238_p4)
}
   0xa   :  { %s245_s15 = smov 256   ;;  %s246_s16 = smov 16  }
   0xb   :  { %24 = dma.hbm_to_vmem [thread:$0]  %s294_s2, 2048, %s19_s13, [#allocation3], %s245_s15, %s245_s15, %s246_s16  }
   0xc   :  { %242 = dma.done.wait [#allocation3], 2048  }
   0xd   :  { %243 = vsyncadd [#allocation3], 4294965248  ;;  %v247_v0 = vmov 0.0   ;;  %v44_v1 = vld [vmem:[#allocation2 + $0x78] sm:$0xff]  ;;  %v43_v2 = vld [vmem:[#allocation2 + $0x70] sm:$0xff]  ;;  %vm45_vm0 = vcmask 523264  }
   0xe   :  { %113 = vmatprep.mubr.f32.mxu0 %v247_v0  ;;  %193 = vmatprep.mubr.f32.mxu1 %v247_v0  ;;  %v42_v3 = vld [vmem:[#allocation2 + $0x68] sm:$0xff]  ;;  %v41_v4 = vld [vmem:[#allocation2 + $0x60] sm:$0xff]  ;;  %v40_v5 = vld [vmem:[#allocation2 + $0x58] sm:$0xff]  ;;  %vm122_vm1 = vcmask 64512  }
   0xf   :  { %65 = vmatprep.subr.mxu0 %v44_v1  ;;  %v39_v6 = vld [vmem:[#allocation2 + $0x50] sm:$0xff]  ;;  %v38_v7 = vld [vmem:[#allocation2 + $0x48] sm:$0xff]  ;;  %v37_v8 = vld [vmem:[#allocation2 + $0x40] sm:$0xff] }
  0x10   :  { %66 = vmatpush1.msra.mxu0 %v43_v2  ;;  %v36_v9 = vld [vmem:[#allocation2 + $0x38] sm:$0xff]  ;;  %v35_v10 = vld [vmem:[#allocation2 + $0x30] sm:$0xff]  ;;  %v34_v11 = vld [vmem:[#allocation2 + $0x28] sm:$0xff] }
  0x11   :  { %67 = vmatprep.subr.mxu0 %v42_v3  ;;  %v33_v12 = vld [vmem:[#allocation2 + $0x20] sm:$0xff]  ;;  %v32_v13 = vld [vmem:[#allocation2 + $0x18] sm:$0xff]  ;;  %v31_v14 = vld [vmem:[#allocation2 + $0x10] sm:$0xff] }
  0x12   :  { %68 = vmatpush1.msra.mxu0 %v41_v4  ;;  %v30_v15 = vld [vmem:[#allocation2 + $0x8] sm:$0xff]  ;;  %v29_v16 = vld [vmem:[#allocation2] sm:$0xff] }
  0x13   :  { %69 = vmatprep.subr.mxu0 %v40_v5  ;;  %v28_v17 = vld [vmem:[%s292_s0] sm:$0xff]  ;;  %v121_v21 = vld [vmem:[%s293_s1 + $0x8] sm:$0xff] }
  0x14   :  { %70 = vmatpush1.msra.mxu0 %v39_v6  ;;  %v120_v20 = vld [vmem:[%s293_s1] sm:$0xff] }
  0x15   :  { %71 = vmatprep.subr.mxu0 %v38_v7 }
  0x16   :  { %72 = vmatpush1.msra.mxu0 %v37_v8 }
  0x17   :  { %73 = vmatprep.subr.mxu0 %v36_v9 }
  0x18   :  { %74 = vmatpush1.msra.mxu0 %v35_v10 }
  0x19   :  { %75 = vmatprep.subr.mxu0 %v34_v11 }
  0x1a   :  { %76 = vmatpush1.msra.mxu0 %v33_v12 }
  0x1b   :  { %77 = vmatprep.subr.mxu0 %v32_v13 }
  0x1c   :  { %78 = vmatpush1.msra.mxu0 %v31_v14 }
  0x1d   :  { %79 = vmatprep.subr.mxu0 %v30_v15 }
  0x1e   :  { %80 = vmatpush1.msra.mxu0 %v29_v16 }
  0x1f   :  { %215 = vmatmul.mubr.msk.f32.vlgmr.msra.gmra.mxu0 %vm45_vm0, %v28_v17 }
  0xdf   :  { %v115_v18 = vpop.f32.mrf.mxu0 }
  0xe1   :  { %v117_v19 = vpop.f32.mrf.mxu0 }
  0xe2   :  { %159 = vmatprep.subr.mxu1 %v117_v19 }
  0xe3   :  { %160 = vmatpush1.msra.mxu1 %v115_v18 }
  0xe4   :  { %216 = vmatmul.mubr.msk.f32.vlgmr.msra.gmra.mxu1 %vm122_vm1, %v120_v20 }
  0xe5   :  { %199 = vmatprep.mubr.f32.mxu1 %v247_v0 }
  0xe8   :  { %217 = vmatmul.mubr.msk.f32.gmra.mxu1 %vm122_vm1, %v121_v21 }
 0x1a4   :  { %v195_v22 = vpop.f32.mrf.mxu1 }
 0x1a5   :  { %206 = vst [vmem:[%s295_s3] sm:$0xff] %v195_v22 }
 0x1a6   :  { %v197_v23 = vpop.f32.mrf.mxu1 }
 0x1a7   :  { %207 = vst [vmem:[%s295_s3 + $0x8] sm:$0xff] %v197_v23 }
 0x1a8   :  { %v201_v24 = vpop.f32.mrf.mxu1 }
 0x1a9   :  { %208 = vst [vmem:[%s295_s3 + $0x10] sm:$0xff] %v201_v24 }
 0x1aa   :  { %v203_v25 = vpop.f32.mrf.mxu1 }
 0x1ab   :  { %209 = vst [vmem:[%s295_s3 + $0x18] sm:$0xff] %v203_v25 }
 0x1ac   :  { %214 = vsyncpa [#allocation3], 1 }

</bundles_post_ra>
